<compile_context>
chip_gen: v7x
topology: tpu7x:2x2x1
jax: 0.10.0
libtpu: 0.0.40
codegen_flags: <defaults>
</compile_context>

<pallas_src>
import jax
import jax.numpy as jnp
from jax.experimental import pallas as pl
from jax.experimental.pallas import tpu as pltpu


# ----------------------------------------------------------------------------
# Pallas kernel: Hartley normalization + A^T A Gram matrix, vectorized over
# the batch block.  Input  : pts_ref [BB, 4, M]  (channels x1,y1,x2,y2 on
# sublanes, points on lanes).  Output: out_ref [BB, 16, 16] with the 9x9
# Gram matrix in [:9, :9] and (s1, cx1, cy1, s2, cx2, cy2) in row 9, cols 0-5.
# ----------------------------------------------------------------------------
def _fmat_gram_kernel(pts_ref, out_ref):
    bb, _, m = pts_ref.shape
    inv_m = jnp.float32(1.0 / m)
    sqrt2 = jnp.float32(1.4142135623730951)
    eps = jnp.float32(1e-8)

    pts = pts_ref[...]                              # [BB, 4, M] f32
    x1 = pts[:, 0:1, :]                             # [BB, 1, M]
    y1 = pts[:, 1:2, :]
    x2 = pts[:, 2:3, :]
    y2 = pts[:, 3:4, :]

    # Hartley normalization: centroid + isotropic scale -> mean dist sqrt(2).
    # All reductions are over the lane (M) axis.
    cx1 = jnp.sum(x1, axis=-1, keepdims=True) * inv_m          # [BB, 1, 1]
    cy1 = jnp.sum(y1, axis=-1, keepdims=True) * inv_m
    cx2 = jnp.sum(x2, axis=-1, keepdims=True) * inv_m
    cy2 = jnp.sum(y2, axis=-1, keepdims=True) * inv_m
    d1 = jnp.sum(jnp.sqrt((x1 - cx1) ** 2 + (y1 - cy1) ** 2),
                 axis=-1, keepdims=True) * inv_m
    d2 = jnp.sum(jnp.sqrt((x2 - cx2) ** 2 + (y2 - cy2) ** 2),
                 axis=-1, keepdims=True) * inv_m
    s1 = sqrt2 / jnp.maximum(d1, eps)
    s2 = sqrt2 / jnp.maximum(d2, eps)

    x1n = s1 * (x1 - cx1)                           # [BB, 1, M]
    y1n = s1 * (y1 - cy1)
    x2n = s2 * (x2 - cx2)
    y2n = s2 * (y2 - cy2)
    ones = jnp.ones_like(x1n)

    # Build A^T [BB, 16, M]: the 9 epipolar-constraint terms (rows of
    # p2^T F p1 = 0, F flattened row-major) on sublanes 0..8, rows 9..15 zero.
    terms = (x2n * x1n, x2n * y1n, x2n,
             y2n * x1n, y2n * y1n, y2n,
             x1n, y1n, ones)
    row_am = jax.lax.broadcasted_iota(jnp.int32, (bb, 16, m), 1)
    At = jnp.zeros((bb, 16, m), jnp.float32)
    for j, t in enumerate(terms):
        At = At + jnp.where(row_am == j, t, 0.0)

    # One batched MXU matmul contracting the lane/M axis:
    # G16[b] = At[b] @ At[b]^T  -> [BB, 16, 16]; the 9x9 A^T A Gram block sits
    # in [:9, :9], everything else is exactly zero (padded rows are zero).
    G16 = jnp.einsum('bim,bjm->bij', At, At,
                     preferred_element_type=jnp.float32)

    # Pack the 6 normalization parameters into the (all-zero) row 9.
    row16 = jax.lax.broadcasted_iota(jnp.int32, (bb, 16, 16), 1)
    col16 = jax.lax.broadcasted_iota(jnp.int32, (bb, 16, 16), 2)
    packed = G16
    for j, p in enumerate((s1, cx1, cy1, s2, cx2, cy2)):
        packed = packed + jnp.where((row16 == 9) & (col16 == j), p, 0.0)

    out_ref[...] = packed


def _tensorcores_per_chip():
    # v7x has 2 TensorCores per chip; v5e/v6e have 1.  Gate the batch split so
    # single-TC chips never pay an extra serial grid step.
    try:
        kind = jax.devices()[0].device_kind.lower()
    except Exception:
        return 1
    return 2 if "v7" in kind else 1


def _fmat_gram_pallas(pts):
    """pts: [B, 4, M] f32 -> packed [B, 16, 16] f32 (Gram + norm params)."""
    b, c, m = pts.shape
    steps = 2 if (_tensorcores_per_chip() >= 2 and b >= 2) else 1

    if steps == 1:
        # Single-TensorCore chips (v5e/v6e): one invocation, no grid, whole
        # (tiny) arrays resident in VMEM.
        return pl.pallas_call(
            _fmat_gram_kernel,
            out_shape=jax.ShapeDtypeStruct((b, 16, 16), jnp.float32),
        )(pts)

    # v7x: 2-way "parallel" split across the two TensorCores.  Pad the batch
    # to even (with a copy of batch 0) so an odd B never idles a core.
    b_pad = b if b % 2 == 0 else b + 1
    if b_pad != b:
        pts = jnp.concatenate([pts, pts[:1]], axis=0)
    bb = b_pad // 2
    out = pl.pallas_call(
        _fmat_gram_kernel,
        out_shape=jax.ShapeDtypeStruct((b_pad, 16, 16), jnp.float32),
        grid=(2,),
        in_specs=[pl.BlockSpec((bb, c, m), lambda i: (i, 0, 0))],
        out_specs=pl.BlockSpec((bb, 16, 16), lambda i: (i, 0, 0)),
        compiler_params=pltpu.CompilerParams(
            dimension_semantics=("parallel",)),
    )(pts)
    return out[:b]


# ----------------------------------------------------------------------------
# Wrapper reproducing reduced_ransac.forward
# ----------------------------------------------------------------------------
class ReducedRansacPallas:
    def __init__(self, check_num, thres, dataset):
        # `thres` is never used in the PyTorch forward (kept for parity).
        self.check_num = check_num
        self.thres = thres
        self.dataset = dataset

    def __call__(self, match, mask, key):
        # match: [B, 4, H, W] f32, mask: [B, 1, H, W] f32
        b, _, h, w = match.shape
        n = h * w
        match_flat = match.reshape(b, 4, n)
        mask_flat = mask.reshape(b, n)

        # top_ratio_sample(ratio=0.2): top-k scores + indices of the mask.
        # TODO(synk): exact top-k stays in XLA lax.top_k (no Pallas sort
        # primitive); for large images this, not the Pallas kernel, dominates.
        k = max(int(0.2 * n), 1)
        _scores, topk_idx = jax.lax.top_k(mask_flat, k)          # [B, k]

        # robust_rand_sample common path (all top-k scores > 0): shared random
        # indices across the batch, exactly like torch.randint.
        # TODO(synk): per-batch data-dependent resampling for partially-zero
        # masks (dynamic shapes) is not ported.
        rand_int = jax.random.randint(key, (self.check_num,), 0, k)
        sel_idx = topk_idx[:, rand_int].astype(jnp.int32)        # [B, M]

        # Gather ONLY the M selected correspondences (O(M) bytes) and keep the
        # [B, 4, M] layout (channels on sublanes, points on lanes) — no
        # wrapper transpose, no full-N streaming into VMEM.
        # TODO(synk): optionally fuse this gather into the kernel with
        # PrefetchScalarGridSpec + manual DMA if launch overhead dominates.
        idx3 = jnp.broadcast_to(sel_idx[:, None, :], (b, 4, self.check_num))
        sel_match = jnp.take_along_axis(match_flat, idx3, axis=2)  # [B, 4, M]
        sel_match = sel_match.astype(jnp.float32)

        # Pallas hot path: Hartley normalization + Gram matrix (packed output).
        packed = _fmat_gram_pallas(sel_match)                    # [B, 16, 16]
        G = packed[:, :9, :9]                                    # A^T A
        s1, cx1, cy1 = packed[:, 9, 0], packed[:, 9, 1], packed[:, 9, 2]
        s2, cx2, cy2 = packed[:, 9, 3], packed[:, 9, 4], packed[:, 9, 5]

        # Smallest eigenvector of A^T A -> normalized F (8-point DLT solve).
        # (Replaces cv2.findFundamentalMat FM_RANSAC / FM_LMEDS.)
        # TODO(synk): Gram+eigh squares the condition number vs. SVD of A;
        # acceptable for this forward-pass port.
        _evals, evecs = jnp.linalg.eigh(G)                       # ascending
        f = evecs[..., :, 0]                                     # [B, 9]
        Fn = f.reshape(b, 3, 3)

        # Rank-2 enforcement via 3x3 SVD.
        U, S, Vt = jnp.linalg.svd(Fn)
        S = S.at[..., 2].set(0.0)
        Fn = U @ (S[..., :, None] * Vt)

        # Denormalize: F = T2^T Fn T1.
        def make_T(s, cx, cy):
            z = jnp.zeros_like(s)
            o = jnp.ones_like(s)
            return jnp.stack([jnp.stack([s, z, -s * cx], -1),
                              jnp.stack([z, s, -s * cy], -1),
                              jnp.stack([z, z, o], -1)], -2)

        T1 = make_T(s1, cx1, cy1)
        T2 = make_T(s2, cx2, cy2)
        F = jnp.matmul(jnp.transpose(T2, (0, 2, 1)), jnp.matmul(Fn, T1))

        # Match cv2 convention of scaling so F[2,2] == 1 when possible.
        denom = F[:, 2:3, 2:3]
        safe = jnp.where(jnp.abs(denom) > 1e-8, denom, jnp.ones_like(denom))
        F = jnp.where(jnp.abs(denom) > 1e-8, F / safe, F)
        return F.astype(jnp.float32)                             # [B, 3, 3]


if __name__ == "__main__":
    key = jax.random.PRNGKey(0)
    k_match, k_mask, k_rand = jax.random.split(key, 3)

    b, h, w = 2, 16, 16
    # match channels: (x1, y1, x2, y2) pixel-ish coordinates.
    match = jax.random.uniform(k_match, (b, 4, h, w), jnp.float32) * 16.0
    mask = jax.random.uniform(k_mask, (b, 1, h, w), jnp.float32)

    model = ReducedRansacPallas(check_num=16, thres=0.2, dataset="kitti")
    F = model(match, mask, k_rand)
    F = jax.block_until_ready(F)

    assert F.shape == (b, 3, 3)
    assert bool(jnp.all(jnp.isfinite(F)))
    print("KERNEL_OK")
</pallas_src>

<mosaic_0001>
module attributes {stable_mosaic.version = 11 : i64} {
  func.func @_fmat_gram_kernel(%arg0: memref<2x4x16xf32, #tpu.memory_space<vmem>>, %arg1: memref<2x16x16xf32, #tpu.memory_space<vmem>>) attributes {dimension_semantics = [], scalar_prefetch = 0 : i64, scratch_operands = 0 : i64, tpu.core_type = #tpu.core_type<tc>} {
    %c0 = arith.constant 0 : index
    %c0_0 = arith.constant 0 : index
    %c0_1 = arith.constant 0 : index
    %0 = vector.load %arg0[%c0, %c0_0, %c0_1] : memref<2x4x16xf32, #tpu.memory_space<vmem>>, vector<2x4x16xf32>
    %1 = vector.extract_strided_slice %0 {offsets = [0, 0, 0], sizes = [2, 1, 16], strides = [1, 1, 1]} : vector<2x4x16xf32> to vector<2x1x16xf32>
    %2 = vector.extract_strided_slice %0 {offsets = [0, 1, 0], sizes = [2, 1, 16], strides = [1, 1, 1]} : vector<2x4x16xf32> to vector<2x1x16xf32>
    %3 = vector.extract_strided_slice %0 {offsets = [0, 2, 0], sizes = [2, 1, 16], strides = [1, 1, 1]} : vector<2x4x16xf32> to vector<2x1x16xf32>
    %4 = vector.extract_strided_slice %0 {offsets = [0, 3, 0], sizes = [2, 1, 16], strides = [1, 1, 1]} : vector<2x4x16xf32> to vector<2x1x16xf32>
    %cst = arith.constant dense<0.000000e+00> : vector<2x1xf32>
    %5 = vector.multi_reduction <add>, %1, %cst [2] : vector<2x1x16xf32> to vector<2x1xf32>
    %6 = vector.shape_cast %5 : vector<2x1xf32> to vector<2x1x1xf32>
    %cst_2 = arith.constant 6.250000e-02 : f32
    %7 = vector.broadcast %cst_2 : f32 to vector<2x1x1xf32>
    %8 = arith.mulf %6, %7 : vector<2x1x1xf32>
    %cst_3 = arith.constant dense<0.000000e+00> : vector<2x1xf32>
    %9 = vector.multi_reduction <add>, %2, %cst_3 [2] : vector<2x1x16xf32> to vector<2x1xf32>
    %10 = vector.shape_cast %9 : vector<2x1xf32> to vector<2x1x1xf32>
    %cst_4 = arith.constant 6.250000e-02 : f32
    %11 = vector.broadcast %cst_4 : f32 to vector<2x1x1xf32>
    %12 = arith.mulf %10, %11 : vector<2x1x1xf32>
    %cst_5 = arith.constant dense<0.000000e+00> : vector<2x1xf32>
    %13 = vector.multi_reduction <add>, %3, %cst_5 [2] : vector<2x1x16xf32> to vector<2x1xf32>
    %14 = vector.shape_cast %13 : vector<2x1xf32> to vector<2x1x1xf32>
    %cst_6 = arith.constant 6.250000e-02 : f32
    %15 = vector.broadcast %cst_6 : f32 to vector<2x1x1xf32>
    %16 = arith.mulf %14, %15 : vector<2x1x1xf32>
    %cst_7 = arith.constant dense<0.000000e+00> : vector<2x1xf32>
    %17 = vector.multi_reduction <add>, %4, %cst_7 [2] : vector<2x1x16xf32> to vector<2x1xf32>
    %18 = vector.shape_cast %17 : vector<2x1xf32> to vector<2x1x1xf32>
    %cst_8 = arith.constant 6.250000e-02 : f32
    %19 = vector.broadcast %cst_8 : f32 to vector<2x1x1xf32>
    %20 = arith.mulf %18, %19 : vector<2x1x1xf32>
    %21 = vector.broadcast %8 : vector<2x1x1xf32> to vector<2x1x16xf32>
    %22 = arith.subf %1, %21 : vector<2x1x16xf32>
    %23 = arith.mulf %22, %22 : vector<2x1x16xf32>
    %24 = vector.broadcast %12 : vector<2x1x1xf32> to vector<2x1x16xf32>
    %25 = arith.subf %2, %24 : vector<2x1x16xf32>
    %26 = arith.mulf %25, %25 : vector<2x1x16xf32>
    %27 = arith.addf %23, %26 : vector<2x1x16xf32>
    %28 = math.sqrt %27 : vector<2x1x16xf32>
    %cst_9 = arith.constant dense<0.000000e+00> : vector<2x1xf32>
    %29 = vector.multi_reduction <add>, %28, %cst_9 [2] : vector<2x1x16xf32> to vector<2x1xf32>
    %30 = vector.shape_cast %29 : vector<2x1xf32> to vector<2x1x1xf32>
    %cst_10 = arith.constant 6.250000e-02 : f32
    %31 = vector.broadcast %cst_10 : f32 to vector<2x1x1xf32>
    %32 = arith.mulf %30, %31 : vector<2x1x1xf32>
    %33 = vector.broadcast %16 : vector<2x1x1xf32> to vector<2x1x16xf32>
    %34 = arith.subf %3, %33 : vector<2x1x16xf32>
    %35 = arith.mulf %34, %34 : vector<2x1x16xf32>
    %36 = vector.broadcast %20 : vector<2x1x1xf32> to vector<2x1x16xf32>
    %37 = arith.subf %4, %36 : vector<2x1x16xf32>
    %38 = arith.mulf %37, %37 : vector<2x1x16xf32>
    %39 = arith.addf %35, %38 : vector<2x1x16xf32>
    %40 = math.sqrt %39 : vector<2x1x16xf32>
    %cst_11 = arith.constant dense<0.000000e+00> : vector<2x1xf32>
    %41 = vector.multi_reduction <add>, %40, %cst_11 [2] : vector<2x1x16xf32> to vector<2x1xf32>
    %42 = vector.shape_cast %41 : vector<2x1xf32> to vector<2x1x1xf32>
    %cst_12 = arith.constant 6.250000e-02 : f32
    %43 = vector.broadcast %cst_12 : f32 to vector<2x1x1xf32>
    %44 = arith.mulf %42, %43 : vector<2x1x1xf32>
    %cst_13 = arith.constant 9.99999993E-9 : f32
    %45 = vector.broadcast %cst_13 : f32 to vector<2x1x1xf32>
    %46 = arith.maximumf %32, %45 : vector<2x1x1xf32>
    %cst_14 = arith.constant 1.41421354 : f32
    %47 = vector.broadcast %cst_14 : f32 to vector<2x1x1xf32>
    %48 = arith.divf %47, %46 : vector<2x1x1xf32>
    %cst_15 = arith.constant 9.99999993E-9 : f32
    %49 = vector.broadcast %cst_15 : f32 to vector<2x1x1xf32>
    %50 = arith.maximumf %44, %49 : vector<2x1x1xf32>
    %cst_16 = arith.constant 1.41421354 : f32
    %51 = vector.broadcast %cst_16 : f32 to vector<2x1x1xf32>
    %52 = arith.divf %51, %50 : vector<2x1x1xf32>
    %53 = vector.broadcast %8 : vector<2x1x1xf32> to vector<2x1x16xf32>
    %54 = arith.subf %1, %53 : vector<2x1x16xf32>
    %55 = vector.broadcast %48 : vector<2x1x1xf32> to vector<2x1x16xf32>
    %56 = arith.mulf %55, %54 : vector<2x1x16xf32>
    %57 = vector.broadcast %12 : vector<2x1x1xf32> to vector<2x1x16xf32>
    %58 = arith.subf %2, %57 : vector<2x1x16xf32>
    %59 = vector.broadcast %48 : vector<2x1x1xf32> to vector<2x1x16xf32>
    %60 = arith.mulf %59, %58 : vector<2x1x16xf32>
    %61 = vector.broadcast %16 : vector<2x1x1xf32> to vector<2x1x16xf32>
    %62 = arith.subf %3, %61 : vector<2x1x16xf32>
    %63 = vector.broadcast %52 : vector<2x1x1xf32> to vector<2x1x16xf32>
    %64 = arith.mulf %63, %62 : vector<2x1x16xf32>
    %65 = vector.broadcast %20 : vector<2x1x1xf32> to vector<2x1x16xf32>
    %66 = arith.subf %4, %65 : vector<2x1x16xf32>
    %67 = vector.broadcast %52 : vector<2x1x1xf32> to vector<2x1x16xf32>
    %68 = arith.mulf %67, %66 : vector<2x1x16xf32>
    %cst_17 = arith.constant 1.000000e+00 : f32
    %69 = vector.broadcast %cst_17 : f32 to vector<2x1x16xf32>
    %70 = arith.mulf %64, %56 : vector<2x1x16xf32>
    %71 = arith.mulf %64, %60 : vector<2x1x16xf32>
    %72 = arith.mulf %68, %56 : vector<2x1x16xf32>
    %73 = arith.mulf %68, %60 : vector<2x1x16xf32>
    %74 = tpu.iota {dimensions = array<i32: 1>} : vector<2x16x16xi32>
    %cst_18 = arith.constant 0.000000e+00 : f32
    %75 = vector.broadcast %cst_18 : f32 to vector<2x16x16xf32>
    %c0_i32 = arith.constant 0 : i32
    %76 = vector.broadcast %c0_i32 : i32 to vector<2x16x16xi32>
    %77 = arith.cmpi eq, %74, %76 : vector<2x16x16xi32>
    %cst_19 = arith.constant 0.000000e+00 : f32
    %78 = vector.shape_cast %70 : vector<2x1x16xf32> to vector<2x1x16xf32>
    %79 = vector.broadcast %78 : vector<2x1x16xf32> to vector<2x16x16xf32>
    %80 = vector.broadcast %cst_19 : f32 to vector<2x16x16xf32>
    %81 = arith.select %77, %79, %80 : vector<2x16x16xi1>, vector<2x16x16xf32>
    %82 = arith.addf %75, %81 : vector<2x16x16xf32>
    %c1_i32 = arith.constant 1 : i32
    %83 = vector.broadcast %c1_i32 : i32 to vector<2x16x16xi32>
    %84 = arith.cmpi eq, %74, %83 : vector<2x16x16xi32>
    %cst_20 = arith.constant 0.000000e+00 : f32
    %85 = vector.shape_cast %71 : vector<2x1x16xf32> to vector<2x1x16xf32>
    %86 = vector.broadcast %85 : vector<2x1x16xf32> to vector<2x16x16xf32>
    %87 = vector.broadcast %cst_20 : f32 to vector<2x16x16xf32>
    %88 = arith.select %84, %86, %87 : vector<2x16x16xi1>, vector<2x16x16xf32>
    %89 = arith.addf %82, %88 : vector<2x16x16xf32>
    %c2_i32 = arith.constant 2 : i32
    %90 = vector.broadcast %c2_i32 : i32 to vector<2x16x16xi32>
    %91 = arith.cmpi eq, %74, %90 : vector<2x16x16xi32>
    %cst_21 = arith.constant 0.000000e+00 : f32
    %92 = vector.shape_cast %64 : vector<2x1x16xf32> to vector<2x1x16xf32>
    %93 = vector.broadcast %92 : vector<2x1x16xf32> to vector<2x16x16xf32>
    %94 = vector.broadcast %cst_21 : f32 to vector<2x16x16xf32>
    %95 = arith.select %91, %93, %94 : vector<2x16x16xi1>, vector<2x16x16xf32>
    %96 = arith.addf %89, %95 : vector<2x16x16xf32>
    %c3_i32 = arith.constant 3 : i32
    %97 = vector.broadcast %c3_i32 : i32 to vector<2x16x16xi32>
    %98 = arith.cmpi eq, %74, %97 : vector<2x16x16xi32>
    %cst_22 = arith.constant 0.000000e+00 : f32
    %99 = vector.shape_cast %72 : vector<2x1x16xf32> to vector<2x1x16xf32>
    %100 = vector.broadcast %99 : vector<2x1x16xf32> to vector<2x16x16xf32>
    %101 = vector.broadcast %cst_22 : f32 to vector<2x16x16xf32>
    %102 = arith.select %98, %100, %101 : vector<2x16x16xi1>, vector<2x16x16xf32>
    %103 = arith.addf %96, %102 : vector<2x16x16xf32>
    %c4_i32 = arith.constant 4 : i32
    %104 = vector.broadcast %c4_i32 : i32 to vector<2x16x16xi32>
    %105 = arith.cmpi eq, %74, %104 : vector<2x16x16xi32>
    %cst_23 = arith.constant 0.000000e+00 : f32
    %106 = vector.shape_cast %73 : vector<2x1x16xf32> to vector<2x1x16xf32>
    %107 = vector.broadcast %106 : vector<2x1x16xf32> to vector<2x16x16xf32>
    %108 = vector.broadcast %cst_23 : f32 to vector<2x16x16xf32>
    %109 = arith.select %105, %107, %108 : vector<2x16x16xi1>, vector<2x16x16xf32>
    %110 = arith.addf %103, %109 : vector<2x16x16xf32>
    %c5_i32 = arith.constant 5 : i32
    %111 = vector.broadcast %c5_i32 : i32 to vector<2x16x16xi32>
    %112 = arith.cmpi eq, %74, %111 : vector<2x16x16xi32>
    %cst_24 = arith.constant 0.000000e+00 : f32
    %113 = vector.shape_cast %68 : vector<2x1x16xf32> to vector<2x1x16xf32>
    %114 = vector.broadcast %113 : vector<2x1x16xf32> to vector<2x16x16xf32>
    %115 = vector.broadcast %cst_24 : f32 to vector<2x16x16xf32>
    %116 = arith.select %112, %114, %115 : vector<2x16x16xi1>, vector<2x16x16xf32>
    %117 = arith.addf %110, %116 : vector<2x16x16xf32>
    %c6_i32 = arith.constant 6 : i32
    %118 = vector.broadcast %c6_i32 : i32 to vector<2x16x16xi32>
    %119 = arith.cmpi eq, %74, %118 : vector<2x16x16xi32>
    %cst_25 = arith.constant 0.000000e+00 : f32
    %120 = vector.shape_cast %56 : vector<2x1x16xf32> to vector<2x1x16xf32>
    %121 = vector.broadcast %120 : vector<2x1x16xf32> to vector<2x16x16xf32>
    %122 = vector.broadcast %cst_25 : f32 to vector<2x16x16xf32>
    %123 = arith.select %119, %121, %122 : vector<2x16x16xi1>, vector<2x16x16xf32>
    %124 = arith.addf %117, %123 : vector<2x16x16xf32>
    %c7_i32 = arith.constant 7 : i32
    %125 = vector.broadcast %c7_i32 : i32 to vector<2x16x16xi32>
    %126 = arith.cmpi eq, %74, %125 : vector<2x16x16xi32>
    %cst_26 = arith.constant 0.000000e+00 : f32
    %127 = vector.shape_cast %60 : vector<2x1x16xf32> to vector<2x1x16xf32>
    %128 = vector.broadcast %127 : vector<2x1x16xf32> to vector<2x16x16xf32>
    %129 = vector.broadcast %cst_26 : f32 to vector<2x16x16xf32>
    %130 = arith.select %126, %128, %129 : vector<2x16x16xi1>, vector<2x16x16xf32>
    %131 = arith.addf %124, %130 : vector<2x16x16xf32>
    %c8_i32 = arith.constant 8 : i32
    %132 = vector.broadcast %c8_i32 : i32 to vector<2x16x16xi32>
    %133 = arith.cmpi eq, %74, %132 : vector<2x16x16xi32>
    %cst_27 = arith.constant 0.000000e+00 : f32
    %134 = vector.shape_cast %69 : vector<2x1x16xf32> to vector<2x1x16xf32>
    %135 = vector.broadcast %134 : vector<2x1x16xf32> to vector<2x16x16xf32>
    %136 = vector.broadcast %cst_27 : f32 to vector<2x16x16xf32>
    %137 = arith.select %133, %135, %136 : vector<2x16x16xi1>, vector<2x16x16xf32>
    %138 = arith.addf %131, %137 : vector<2x16x16xf32>
    "tpu.trace_start"() <{level = 10 : i32, message = "bim,bjm->bij"}> : () -> ()
    %cst_28 = arith.constant dense<0.000000e+00> : vector<2x16x16xf32>
    %139 = tpu.matmul %138, %138, %cst_28 {dimension_numbers = #tpu.dot_dimension_numbers<[2], [2], [1], [1], [0, 0, 0, 1, 1, 1], [0], [0]>} : vector<2x16x16xf32>, vector<2x16x16xf32>, vector<2x16x16xf32> -> vector<2x16x16xf32>
    "tpu.trace_stop"() : () -> ()
    %140 = tpu.iota {dimensions = array<i32: 1>} : vector<2x16x16xi32>
    %141 = tpu.iota {dimensions = array<i32: 2>} : vector<2x16x16xi32>
    %c9_i32 = arith.constant 9 : i32
    %142 = vector.broadcast %c9_i32 : i32 to vector<2x16x16xi32>
    %143 = arith.cmpi eq, %140, %142 : vector<2x16x16xi32>
    %c0_i32_29 = arith.constant 0 : i32
    %144 = vector.broadcast %c0_i32_29 : i32 to vector<2x16x16xi32>
    %145 = arith.cmpi eq, %141, %144 : vector<2x16x16xi32>
    %146 = arith.andi %143, %145 : vector<2x16x16xi1>
    %cst_30 = arith.constant 0.000000e+00 : f32
    %147 = vector.shape_cast %48 : vector<2x1x1xf32> to vector<2x1x1xf32>
    %148 = vector.broadcast %147 : vector<2x1x1xf32> to vector<2x16x16xf32>
    %149 = vector.broadcast %cst_30 : f32 to vector<2x16x16xf32>
    %150 = arith.select %146, %148, %149 : vector<2x16x16xi1>, vector<2x16x16xf32>
    %151 = arith.addf %139, %150 : vector<2x16x16xf32>
    %c9_i32_31 = arith.constant 9 : i32
    %152 = vector.broadcast %c9_i32_31 : i32 to vector<2x16x16xi32>
    %153 = arith.cmpi eq, %140, %152 : vector<2x16x16xi32>
    %c1_i32_32 = arith.constant 1 : i32
    %154 = vector.broadcast %c1_i32_32 : i32 to vector<2x16x16xi32>
    %155 = arith.cmpi eq, %141, %154 : vector<2x16x16xi32>
    %156 = arith.andi %153, %155 : vector<2x16x16xi1>
    %cst_33 = arith.constant 0.000000e+00 : f32
    %157 = vector.shape_cast %8 : vector<2x1x1xf32> to vector<2x1x1xf32>
    %158 = vector.broadcast %157 : vector<2x1x1xf32> to vector<2x16x16xf32>
    %159 = vector.broadcast %cst_33 : f32 to vector<2x16x16xf32>
    %160 = arith.select %156, %158, %159 : vector<2x16x16xi1>, vector<2x16x16xf32>
    %161 = arith.addf %151, %160 : vector<2x16x16xf32>
    %c9_i32_34 = arith.constant 9 : i32
    %162 = vector.broadcast %c9_i32_34 : i32 to vector<2x16x16xi32>
    %163 = arith.cmpi eq, %140, %162 : vector<2x16x16xi32>
    %c2_i32_35 = arith.constant 2 : i32
    %164 = vector.broadcast %c2_i32_35 : i32 to vector<2x16x16xi32>
    %165 = arith.cmpi eq, %141, %164 : vector<2x16x16xi32>
    %166 = arith.andi %163, %165 : vector<2x16x16xi1>
    %cst_36 = arith.constant 0.000000e+00 : f32
    %167 = vector.shape_cast %12 : vector<2x1x1xf32> to vector<2x1x1xf32>
    %168 = vector.broadcast %167 : vector<2x1x1xf32> to vector<2x16x16xf32>
    %169 = vector.broadcast %cst_36 : f32 to vector<2x16x16xf32>
    %170 = arith.select %166, %168, %169 : vector<2x16x16xi1>, vector<2x16x16xf32>
    %171 = arith.addf %161, %170 : vector<2x16x16xf32>
    %c9_i32_37 = arith.constant 9 : i32
    %172 = vector.broadcast %c9_i32_37 : i32 to vector<2x16x16xi32>
    %173 = arith.cmpi eq, %140, %172 : vector<2x16x16xi32>
    %c3_i32_38 = arith.constant 3 : i32
    %174 = vector.broadcast %c3_i32_38 : i32 to vector<2x16x16xi32>
    %175 = arith.cmpi eq, %141, %174 : vector<2x16x16xi32>
    %176 = arith.andi %173, %175 : vector<2x16x16xi1>
    %cst_39 = arith.constant 0.000000e+00 : f32
    %177 = vector.shape_cast %52 : vector<2x1x1xf32> to vector<2x1x1xf32>
    %178 = vector.broadcast %177 : vector<2x1x1xf32> to vector<2x16x16xf32>
    %179 = vector.broadcast %cst_39 : f32 to vector<2x16x16xf32>
    %180 = arith.select %176, %178, %179 : vector<2x16x16xi1>, vector<2x16x16xf32>
    %181 = arith.addf %171, %180 : vector<2x16x16xf32>
    %c9_i32_40 = arith.constant 9 : i32
    %182 = vector.broadcast %c9_i32_40 : i32 to vector<2x16x16xi32>
    %183 = arith.cmpi eq, %140, %182 : vector<2x16x16xi32>
    %c4_i32_41 = arith.constant 4 : i32
    %184 = vector.broadcast %c4_i32_41 : i32 to vector<2x16x16xi32>
    %185 = arith.cmpi eq, %141, %184 : vector<2x16x16xi32>
    %186 = arith.andi %183, %185 : vector<2x16x16xi1>
    %cst_42 = arith.constant 0.000000e+00 : f32
    %187 = vector.shape_cast %16 : vector<2x1x1xf32> to vector<2x1x1xf32>
    %188 = vector.broadcast %187 : vector<2x1x1xf32> to vector<2x16x16xf32>
    %189 = vector.broadcast %cst_42 : f32 to vector<2x16x16xf32>
    %190 = arith.select %186, %188, %189 : vector<2x16x16xi1>, vector<2x16x16xf32>
    %191 = arith.addf %181, %190 : vector<2x16x16xf32>
    %c9_i32_43 = arith.constant 9 : i32
    %192 = vector.broadcast %c9_i32_43 : i32 to vector<2x16x16xi32>
    %193 = arith.cmpi eq, %140, %192 : vector<2x16x16xi32>
    %c5_i32_44 = arith.constant 5 : i32
    %194 = vector.broadcast %c5_i32_44 : i32 to vector<2x16x16xi32>
    %195 = arith.cmpi eq, %141, %194 : vector<2x16x16xi32>
    %196 = arith.andi %193, %195 : vector<2x16x16xi1>
    %cst_45 = arith.constant 0.000000e+00 : f32
    %197 = vector.shape_cast %20 : vector<2x1x1xf32> to vector<2x1x1xf32>
    %198 = vector.broadcast %197 : vector<2x1x1xf32> to vector<2x16x16xf32>
    %199 = vector.broadcast %cst_45 : f32 to vector<2x16x16xf32>
    %200 = arith.select %196, %198, %199 : vector<2x16x16xi1>, vector<2x16x16xf32>
    %201 = arith.addf %191, %200 : vector<2x16x16xf32>
    %c0_46 = arith.constant 0 : index
    %c0_47 = arith.constant 0 : index
    %c0_48 = arith.constant 0 : index
    %202 = vector.load %arg1[%c0_46, %c0_47, %c0_48] : memref<2x16x16xf32, #tpu.memory_space<vmem>>, vector<2x16x16xf32>
    tpu.vector_store %arg1[%c0_46, %c0_47, %c0_48], %201 {strides = array<i32>} : memref<2x16x16xf32, #tpu.memory_space<vmem>>, vector<2x16x16xf32>,
    return
  }
}

</mosaic_0001>

<bundles_post_ra>
// kernel: tpu_custom_call.1
= control target key start
LH: loop header
LB: loop body
LE: loop exit
PB: predicated region body
PF: predicated region fallthrough
CT: control target
= control target key end

     0   :  { %6 = vsyncpa [#allocation3], 0  ;;  %s1072_s0 = inlined_call_operand.hbm [shape: f32[2,4,16], index: 0, kind: input, shape index: {}]   ;;  %s1073_s1 = inlined_call_operand.hbm [shape: f32[2,16,16], index: 1, kind: output, shape index: {}]  }
   0x1   :  { %7 = vsyncpa [#allocation4], 0  ;;  %s755_s6 = smov [#allocation2]   ;;  %s707_s10 = scalar_lea.hbm %s1072_s0, 128 }
   0x2   :  { %s13_s7 = sshll.u32 %s755_s6, 4  ;;  %p708_p0 = scmp.ne.s32.totalorder %s1072_s0, %s707_s10  ;;  %s14_s7 = int_to_ptr.vmem [resolvable:$true] %s13_s7 }
   0x3   :  { %p711_p1 = scmp.lt.u32.totalorder %s707_s10, %s1072_s0 }
   0x5   :  { %p713_p2 = pnand %p711_p1, %p708_p0 }
   0x7   :  { %716 = shalt.err (!%p713_p2)
}
   0x8   :  { %s717_s15 = scalar_lea.vmem %s14_s7, 128  ;;  %p722_p4 = scmp.lt.s32.totalorder %s14_s7, %s14_s7 }
   0x9   :  { %p718_p3 = scmp.ne.s32.totalorder %s14_s7, %s717_s15  ;;  %p723_p5 = scmp.lt.s32.totalorder %s717_s15, %s717_s15 }
   0xb   :  { %p724_p6 = por %p723_p5, %p722_p4 }
   0xd   :  { %p725_p7 = pnand %p724_p6, %p718_p3 }
   0xf   :  { %728 = shalt.err (!%p725_p7)
}
  0x10   :  { %s756_s16 = smov 64   ;;  %s757_s17 = smov 4  }
  0x11   :  { %19 = dma.hbm_to_vmem [thread:$0]  %s1072_s0, 128, %s14_s7, [#allocation3], %s756_s16, %s756_s16, %s757_s17  }
  0x12   :  { %751 = dma.done.wait [#allocation3], 128  }
  0x13   :  { %752 = vsyncadd [#allocation3], 4294967168  ;;  %vm34_vm0 = vcmask 123905   ;;  %vm25_vm1 = vcmask 122880   ;;  %v784_v0 = vld [vmem:[#allocation2] sm:$0xf]  ;;  %v189_v10 = vlaneseq }
  0x14   :  { %v786_v1 = vld [vmem:[#allocation2 + $0x4] sm:$0xf]  ;;  %v35_v2 = vsel %vm34_vm0, %v784_v0, 0.0  ;;  %v26_v3 = vsel %vm25_vm1, %v784_v0, 0.0  ;;  %vm52_vm2 = vcmask 125955   ;;  %vm43_vm3 = vcmask 124930  }
  0x15   :  { %36 = vadd.xlane.f32.xlu0 %v35_v2  ;;  %27 = vadd.xlane.f32.xlu1 %v26_v3  ;;  %v38_v4 = vsel %vm34_vm0, %v786_v1, 0.0  ;;  %v29_v5 = vsel %vm25_vm1, %v786_v1, 0.0  ;;  %v53_v6 = vsel %vm52_vm2, %v784_v0, 0.0  ;;  %v56_v7 = vsel %vm52_vm2, %v786_v1, 0.0  ;;  %s759_s0 = smov [#allocation5]  }
  0x16   :  { %v44_v8 = vsel %vm43_vm3, %v784_v0, 0.0  ;;  %v47_v9 = vsel %vm43_vm3, %v786_v1, 0.0  ;;  %v800_v11 = vshrl.u32 %v189_v10, 7  ;;  %v805_v13 = vand.u32 127, %v189_v10  ;;  %s630_s20 = sshll.u32 %s759_s0, 4  ;;  %s631_s20 = int_to_ptr.vmem [resolvable:$true] %s630_s20 }
  0x17   :  { %s729_s21 = scalar_lea.vmem %s631_s20, 512  ;;  %p734_p9 = scmp.lt.s32.totalorder %s631_s20, %s631_s20 }
  0x18   :  { %v803_v12 = vadd.s32 8, %v800_v11  ;;  %vm545_vm5 = vcmp.eq.s32.totalorder %v805_v13, 2  ;;  %v550_v14 = vsub.s32 1, %v800_v11  ;;  %v811_v15 = vsub.s32 0, %v800_v11  ;;  %p730_p8 = scmp.ne.s32.totalorder %s631_s20, %s729_s21  ;;  %p735_p10 = scmp.lt.s32.totalorder %s729_s21, %s729_s21 }
  0x19   :  { %39 = vadd.xlane.f32.xlu0 %v38_v4  ;;  %30 = vadd.xlane.f32.xlu1 %v29_v5  ;;  %vm526_vm6 = vcmp.eq.s32.totalorder %v805_v13, 1  ;;  %vm602_vm9 = vcmp.eq.s32.totalorder %v805_v13, 5  ;;  %v607_v35 = vsub.s32 3, %v800_v11  ;;  %v857_v44 = vsub.s32 2, %v800_v11 }
  0x1a   :  { %vm347_vm4 = vcmp.eq.s32.totalorder %v803_v12, 9  ;;  %vm583_vm11 = vcmp.eq.s32.totalorder %v805_v13, 4  ;;  %p736_p11 = por %p735_p10, %p734_p9 }
  0x1b   :  { %vm816_vm7 = vmand %vm347_vm4, %vm545_vm5 }
  0x1c   :  { %vm831_vm8 = vmand %vm347_vm4, %vm526_vm6  ;;  %p737_p12 = pnand %p736_p11, %p730_p8 }
  0x1d   :  { %54 = vadd.xlane.f32.xlu0 %v53_v6  ;;  %57 = vadd.xlane.f32.xlu1 %v56_v7  ;;  %vm866_vm10 = vmand %vm347_vm4, %vm602_vm9  ;;  %vm192_vm9 = vcmp.eq.s32.totalorder %v800_v11, 0 }
  0x1e   :  { %vm585_vm12 = vmand %vm347_vm4, %vm583_vm11  ;;  %vm210_vm11 = vcmp.eq.s32.totalorder %v800_v11, 1 }
  0x21   :  { %45 = vadd.xlane.f32.xlu0 %v44_v8  ;;  %48 = vadd.xlane.f32.xlu1 %v47_v9 }
  0xa2   :  { %v37_v16 = vpop.xlane.xlu0 %36  ;;  %v28_v17 = vpop.xlane.xlu1 %27 }
  0xa3   :  { %v41_v18 = vmul.f32 0.0625, %v37_v16  ;;  %v32_v19 = vmul.f32 0.0625, %v28_v17 }
  0xa5   :  { %v821_v21 = vsub.f32 %v784_v0, %v41_v18  ;;  %v823_v22 = vrot.slane %v41_v18, %v550_v14  ;;  %v826_v23 = vsub.f32 %v784_v0, %v32_v19  ;;  %v532_v24 = vrot.slane %v32_v19, %v811_v15 }
  0xa6   :  { %v40_v26 = vpop.xlane.xlu0 %39  ;;  %v31_v27 = vpop.xlane.xlu1 %30 }
  0xa7   :  { %v67_v28 = vmul.f32 %v821_v21, %v821_v21  ;;  %v557_v29 = vsel %vm816_vm7, %v823_v22, 0.0  ;;  %v42_v30 = vmul.f32 0.0625, %v40_v26  ;;  %v33_v31 = vmul.f32 0.0625, %v31_v27 }
  0xa8   :  { %v842_v32 = vsel %vm831_vm8, %v532_v24, 0.0  ;;  %v63_v34 = vmul.f32 %v826_v23, %v826_v23 }
  0xa9   :  { %v71_v33 = vrot.slane %v67_v28, 1  ;;  %v849_v36 = vsub.f32 %v786_v1, %v42_v30  ;;  %v851_v37 = vrot.slane %v42_v30, %v550_v14  ;;  %v854_v38 = vsub.f32 %v786_v1, %v33_v31 }
  0xaa   :  { %v55_v39 = vpop.xlane.xlu0 %54  ;;  %v58_v40 = vpop.xlane.xlu1 %57  ;;  %v536_v56 = vrot.slane %v33_v31, %v811_v15 }
  0xab   :  { %v75_v41 = vadd.f32 %v71_v33, %v63_v34  ;;  %v59_v42 = vmul.f32 0.0625, %v55_v39  ;;  %v60_v43 = vmul.f32 0.0625, %v58_v40  ;;  %v68_v45 = vmul.f32 %v849_v36, %v849_v36 }
  0xac   :  { %v559_v46 = vsel %vm816_vm7, %v851_v37, 0.0  ;;  %v64_v53 = vmul.f32 %v854_v38, %v854_v38  ;;  %v910_v9 = vsel %vm831_vm8, %v536_v56, 0.0 }
  0xad   :  { %v871_v48 = vsub.f32 %v784_v0, %v59_v42  ;;  %v873_v49 = vrot.slane %v59_v42, %v607_v35  ;;  %v876_v50 = vsub.f32 %v786_v1, %v60_v43  ;;  %v878_v51 = vrot.slane %v60_v43, %v607_v35 }
  0xae   :  { %v72_v52 = vrot.slane %v68_v45, 1  ;;  %v46_v54 = vpop.xlane.xlu0 %45  ;;  %v49_v55 = vpop.xlane.xlu1 %48  ;;  %691 = vrsqrt.f32 %v75_v41  ;;  %vm79_vm13 = vcmp.eq.f32.partialorder %v75_v41, inf  ;;  %v82_v19 = vand.u32 2147483648, %v75_v41 }
  0xaf   :  { %v614_v57 = vsel %vm866_vm10, %v873_v49, 0.0  ;;  %v105_v59 = vmul.f32 %v871_v48, %v871_v48  ;;  %v616_v60 = vsel %vm866_vm10, %v878_v51, 0.0  ;;  %v50_v61 = vmul.f32 0.0625, %v46_v54 }
  0xb0   :  { %v76_v58 = vadd.f32 %v72_v52, %v64_v53  ;;  %v106_v62 = vmul.f32 %v876_v50, %v876_v50  ;;  %v51_v63 = vmul.f32 0.0625, %v49_v55  ;;  %vm81_vm14 = vcmp.eq.f32.partialorder %v75_v41, 0.0 }
  0xb1   :  { %v897_v2 = vsub.f32 %v784_v0, %v50_v61  ;;  %v589_v3 = vrot.slane %v50_v61, %v857_v44  ;;  %v109_v6 = vrot.slane %v105_v59, 1 }
  0xb2   :  { %693 = vrsqrt.f32 %v76_v58  ;;  %v901_v4 = vsub.f32 %v786_v1, %v51_v63  ;;  %v593_v5 = vrot.slane %v51_v63, %v857_v44  ;;  %v110_v0 = vrot.slane %v106_v62, 1 }
  0xb3   :  { %v101_v7 = vmul.f32 %v897_v2, %v897_v2  ;;  %v906_v8 = vsel %vm585_vm12, %v589_v3, 0.0  ;;  %vm86_vm15 = vcmp.eq.f32.partialorder %v76_v58, inf  ;;  %v89_v30 = vand.u32 2147483648, %v76_v58 }
  0xb4   :  { %v102_v10 = vmul.f32 %v901_v4, %v901_v4  ;;  %v914_v14 = vsel %vm585_vm12, %v593_v5, 0.0  ;;  %vm88_vm0 = vcmp.eq.f32.partialorder %v76_v58, 0.0  ;;  %vm228_vm12 = vcmp.eq.s32.totalorder %v800_v11, 2 }
  0xb5   :  { %v113_v1 = vadd.f32 %v109_v6, %v101_v7 }
  0xb6   :  { %v114_v16 = vadd.f32 %v110_v0, %v102_v10 }
  0xb7   :  { %695 = vrsqrt.f32 %v113_v1  ;;  %vm117_vm2 = vcmp.eq.f32.partialorder %v113_v1, inf  ;;  %v120_v42 = vand.u32 2147483648, %v113_v1  ;;  %vm119_vm5 = vcmp.eq.f32.partialorder %v113_v1, 0.0 }
  0xb8   :  { %v692_v17 = vpop.eup %691  ;;  %697 = vrsqrt.f32 %v114_v16  ;;  %vm124_vm6 = vcmp.eq.f32.partialorder %v114_v16, inf  ;;  %v127_v45 = vand.u32 2147483648, %v114_v16  ;;  %vm126_vm8 = vcmp.eq.f32.partialorder %v114_v16, 0.0 }
  0xb9   :  { %v78_v18 = vmul.f32 %v692_v17, %v75_v41 }
  0xbb   :  { %v80_v24 = vsel %vm79_vm13, %v75_v41, %v78_v18  ;;  %vm564_vm13 = vcmp.eq.s32.totalorder %v805_v13, 3 }
  0xbc   :  { %v694_v26 = vpop.eup %693  ;;  %v83_v25 = vsel %vm81_vm14, %v82_v19, %v80_v24  ;;  %vm246_vm14 = vcmp.eq.s32.totalorder %v800_v11, 3 }
  0xbd   :  { %v91_v27 = vsel %vm25_vm1, %v83_v25, 0.0  ;;  %v85_v28 = vmul.f32 %v694_v26, %v76_v58  ;;  %v153_v25 = vrot.slane %v821_v21, 1  ;;  %v164_v21 = vrot.slane %v876_v50, 1 }
  0xbe   :  { %92 = vadd.xlane.f32.xlu0 %v91_v27 }
  0xbf   :  { %v87_v31 = vsel %vm86_vm15, %v76_v58, %v85_v28  ;;  %vm970_vm15 = vmand %vm347_vm4, %vm564_vm13 }
  0xc0   :  { %v90_v33 = vsel %vm88_vm0, %v89_v30, %v87_v31  ;;  %vm264_vm0 = vcmp.eq.s32.totalorder %v800_v11, 4 }
  0xc1   :  { %v94_v34 = vsel %vm25_vm1, %v90_v33, 0.0  ;;  %v696_v35 = vpop.eup %695  ;;  %vm348_vm1 = vcmp.eq.s32.totalorder %v805_v13, 0  ;;  %v154_v33 = vrot.slane %v849_v36, 1 }
  0xc2   :  { %95 = vadd.xlane.f32.xlu1 %v94_v34  ;;  %v698_v39 = vpop.eup %697  ;;  %v116_v40 = vmul.f32 %v696_v35, %v113_v1 }
  0xc3   :  { %v123_v41 = vmul.f32 %v698_v39, %v114_v16 }
  0xc4   :  { %v118_v43 = vsel %vm117_vm2, %v113_v1, %v116_v40  ;;  %v163_v40 = vrot.slane %v871_v48, 1  ;;  %vm300_vm2 = vcmp.eq.s32.totalorder %v800_v11, 6 }
  0xc5   :  { %v121_v52 = vsel %vm119_vm5, %v120_v42, %v118_v43  ;;  %v125_v53 = vsel %vm124_vm6, %v114_v16, %v123_v41  ;;  %vm318_vm5 = vcmp.eq.s32.totalorder %v800_v11, 7  ;;  %vm337_vm6 = vcmp.eq.s32.totalorder %v803_v12, 8 }
  0xc6   :  { %v129_v54 = vsel %vm43_vm3, %v121_v52, 0.0  ;;  %v128_v55 = vsel %vm126_vm8, %v127_v45, %v125_v53  ;;  %vm363_vm8 = vcmask 130048  }
  0xc7   :  { %130 = vadd.xlane.f32.xlu0 %v129_v54  ;;  %v132_v56 = vsel %vm43_vm3, %v128_v55, 0.0  ;;  %vm350_vm3 = vmand %vm347_vm4, %vm348_vm1  ;;  %vm282_vm4 = vcmp.eq.s32.totalorder %v800_v11, 5 }
  0xc8   :  { %133 = vadd.xlane.f32.xlu1 %v132_v56  ;;  %vm673_vm1 = vmpackc.low %vm363_vm8, %vm363_vm8 }
 0x14b   :  { %v93_v58 = vpop.xlane.xlu0 %92 }
 0x14c   :  { %v97_v59 = vmul.f32 0.0625, %v93_v58 }
 0x14e   :  { %v137_v61 = vmax.f32 %v97_v59, 1e-08 }
 0x14f   :  { %v96_v62 = vpop.xlane.xlu1 %95 }
 0x150   :  { %699 = vrcp.f32 %v137_v61  ;;  %v98_v63 = vmul.f32 0.0625, %v96_v62 }
 0x152   :  { %v138_v3 = vmax.f32 %v98_v63, 1e-08 }
 0x154   :  { %701 = vrcp.f32 %v138_v3  ;;  %v131_v5 = vpop.xlane.xlu0 %130 }
 0x155   :  { %v135_v6 = vmul.f32 0.0625, %v131_v5  ;;  %v134_v7 = vpop.xlane.xlu1 %133 }
 0x156   :  { %v136_v0 = vmul.f32 0.0625, %v134_v7 }
 0x157   :  { %v143_v10 = vmax.f32 %v135_v6, 1e-08 }
 0x158   :  { %v144_v1 = vmax.f32 %v136_v0, 1e-08 }
 0x159   :  { %703 = vrcp.f32 %v143_v10 }
 0x15a   :  { %v700_v16 = vpop.eup %699  ;;  %705 = vrcp.f32 %v144_v1 }
 0x15b   :  { %v140_v17 = vmul.f32 1.4142135, %v700_v16 }
 0x15d   :  { %v354_v18 = vrot.slane %v140_v17, %v811_v15  ;;  %v929_v28 = vmul.f32 %v140_v17, %v826_v23  ;;  %v931_v30 = vmul.f32 %v153_v25, %v140_v17 }
 0x15e   :  { %v702_v19 = vpop.eup %701 }
 0x15f   :  { %v142_v24 = vmul.f32 1.4142135, %v702_v19  ;;  %v924_v26 = vsel %vm350_vm3, %v354_v18, 0.0  ;;  %v171_v36 = vrot.slane %v929_v28, 6 }
 0x161   :  { %v358_v27 = vrot.slane %v142_v24, %v811_v15  ;;  %v935_v34 = vmul.f32 %v142_v24, %v854_v38  ;;  %v942_v23 = vmul.f32 %v154_v33, %v142_v24  ;;  %v179_v38 = vrot.slane %v931_v30, 6 }
 0x163   :  { %v704_v31 = vpop.eup %703  ;;  %v937_v35 = vsel %vm350_vm3, %v358_v27, 0.0  ;;  %v172_v48 = vrot.slane %v935_v34, 6  ;;  %v180_v58 = vrot.slane %v942_v23, 6 }
 0x164   :  { %v706_v39 = vpop.eup %705  ;;  %v146_v42 = vmul.f32 1.4142135, %v704_v31 }
 0x165   :  { %v148_v41 = vmul.f32 1.4142135, %v706_v39 }
 0x166   :  { %v159_v43 = vmul.f32 %v146_v42, %v897_v2  ;;  %v167_v45 = vmul.f32 %v163_v40, %v146_v42  ;;  %v570_v62 = vrot.slane %v146_v42, %v857_v44 }
 0x167   :  { %v160_v52 = vmul.f32 %v148_v41, %v901_v4  ;;  %v948_v53 = vmul.f32 %v164_v21, %v148_v41  ;;  %v574_v63 = vrot.slane %v148_v41, %v857_v44 }
 0x168   :  { %v175_v50 = vmul.f32 %v171_v36, %v159_v43  ;;  %v183_v54 = vmul.f32 %v179_v38, %v159_v43  ;;  %v185_v55 = vmul.f32 %v171_v36, %v167_v45  ;;  %v187_v56 = vmul.f32 %v179_v38, %v167_v45 }
 0x169   :  { %v176_v2 = vmul.f32 %v172_v48, %v160_v52  ;;  %v233_v59 = vrot.slane %v159_v43, %v857_v44  ;;  %v184_v3 = vmul.f32 %v180_v58, %v160_v52  ;;  %v186_v5 = vmul.f32 %v172_v48, %v948_v53 }
 0x16a   :  { %v197_v4 = vrot.slane %v175_v50, %v857_v44  ;;  %v215_v61 = vrot.slane %v183_v54, %v857_v44  ;;  %v251_v7 = vrot.slane %v185_v55, %v857_v44  ;;  %v188_v0 = vmul.f32 %v180_v58, %v948_v53 }
 0x16b   :  { %v237_v1 = vrot.slane %v160_v52, %v857_v44  ;;  %v201_v17 = vrot.slane %v176_v2, %v857_v44  ;;  %v219_v18 = vrot.slane %v184_v3, %v857_v44  ;;  %v238_v19 = vsel %vm228_vm12, %v233_v59, 0.0 }
 0x16c   :  { %v202_v6 = vsel %vm192_vm9, %v197_v4, 0.0  ;;  %v220_v13 = vsel %vm210_vm11, %v215_v61, 0.0  ;;  %v269_v24 = vrot.slane %v187_v56, %v857_v44  ;;  %v255_v25 = vrot.slane %v186_v5, %v857_v44 }
 0x16d   :  { %v224_v16 = vadd.f32 %v220_v13, %v202_v6  ;;  %v204_v31 = vsel %vm192_vm9, %v201_v17, 0.0  ;;  %v222_v33 = vsel %vm210_vm11, %v219_v18, 0.0  ;;  %v576_v39 = vsel %vm970_vm15, %v570_v62, 0.0 }
 0x16e   :  { %v256_v40 = vsel %vm246_vm14, %v251_v7, 0.0  ;;  %v287_v42 = vrot.slane %v167_v45, %v857_v44  ;;  %v226_v21 = vadd.f32 %v222_v33, %v204_v31  ;;  %v240_v43 = vsel %vm228_vm12, %v237_v1, 0.0 }
 0x16f   :  { %v242_v27 = vadd.f32 %v238_v19, %v224_v16  ;;  %v273_v36 = vrot.slane %v188_v0, %v857_v44  ;;  %v578_v38 = vsel %vm970_vm15, %v574_v63, 0.0  ;;  %v274_v52 = vsel %vm264_vm0, %v269_v24, 0.0 }
 0x170   :  { %v305_v48 = vrot.slane %v929_v28, %v811_v15  ;;  %v244_v50 = vadd.f32 %v240_v43, %v226_v21  ;;  %v258_v54 = vsel %vm246_vm14, %v255_v25, 0.0  ;;  %v291_v55 = vrot.slane %v948_v53, %v857_v44 }
 0x171   :  { %v260_v41 = vadd.f32 %v256_v40, %v242_v27  ;;  %v292_v56 = vsel %vm282_vm4, %v287_v42, 0.0  ;;  %v323_v2 = vrot.slane %v931_v30, %v811_v15  ;;  %v276_v59 = vsel %vm264_vm0, %v273_v36, 0.0 }
 0x172   :  { %v262_v58 = vadd.f32 %v258_v54, %v244_v50  ;;  %v309_v4 = vrot.slane %v935_v34, %v811_v15  ;;  %v310_v61 = vsel %vm300_vm2, %v305_v48, 0.0  ;;  %v294_v62 = vsel %vm282_vm4, %v291_v55, 0.0 }
 0x173   :  { %v278_v45 = vadd.f32 %v274_v52, %v260_v41  ;;  %v327_v30 = vrot.slane %v942_v23, %v811_v15  ;;  %v328_v12 = vsel %vm318_vm5, %v323_v2, 0.0  ;;  %v758_v3 = vmov 0.0  }
 0x174   :  { %v280_v44 = vadd.f32 %v276_v59, %v262_v58  ;;  %v339_v5 = vsel %vm337_vm6, 1.0, %v758_v3  ;;  %v312_v34 = vsel %vm300_vm2, %v309_v4, 0.0 }
 0x175   :  { %v296_v28 = vadd.f32 %v292_v56, %v278_v45  ;;  %v330_v7 = vsel %vm318_vm5, %v327_v30, 0.0 }
 0x176   :  { %v298_v63 = vadd.f32 %v294_v62, %v280_v44 }
 0x177   :  { %v314_v53 = vadd.f32 %v310_v61, %v296_v28 }
 0x178   :  { %v316_v13 = vadd.f32 %v312_v34, %v298_v63 }
 0x179   :  { %v332_v6 = vadd.f32 %v328_v12, %v314_v53 }
 0x17a   :  { %v334_v23 = vadd.f32 %v330_v7, %v316_v13 }
 0x17b   :  { %662 = vmatprep.mubr.msk.f32.mxu0 %vm363_vm8, %v332_v6  ;;  %v672_v15 = vpack.c.bf16 %v339_v5, %v332_v6 }
 0x17c   :  { %669 = vmatprep.mubr.msk.f32.mxu1 %vm363_vm8, %v334_v23  ;;  %v678_v0 = vpack.c.bf16 %v339_v5, %v334_v23 }
 0x17d   :  { %674 = vmatprep.subr.msk.bf16.mxu0 %vm673_vm1, %v672_v15 }
 0x17e   :  { %677 = vmatpush3.bf16.xpose.msk.msra.mxu0 %vm673_vm1, %v672_v15  ;;  %680 = vmatprep.subr.msk.bf16.mxu1 %vm673_vm1, %v678_v0 }
 0x17f   :  { %683 = vmatpush3.bf16.xpose.msk.msra.mxu1 %vm673_vm1, %v678_v0 }
 0x185   :  { %663 = vmatmul.mubr.msk.f32.vlgmr.msra.gmra.mrb[0].mxu0 %vm363_vm8, %v339_v5 }
 0x186   :  { %670 = vmatmul.mubr.msk.f32.vlgmr.msra.gmra.mrb[0].mxu1 %vm363_vm8, %v339_v5 }
 0x258   :  { %v664_v10 = vpop.f32.mrb[0].mxu0 }
 0x259   :  { %v442_v1 = vadd.f32 %v664_v10, %v924_v26  ;;  %v436_v16 = vpop.f32.mrb[1].mxu0  ;;  %v671_v17 = vpop.f32.mrb[0].mxu1 }
 0x25a   :  { %621 = vst.msk [vmem:[#allocation5] sm:$0xff] %vm363_vm8, %v436_v16  ;;  %v523_v18 = vadd.f32 %v671_v17, %v937_v35  ;;  %v517_v19 = vpop.f32.mrb[1].mxu1 }
 0x25b   :  { %v542_v11 = vadd.f32 %v842_v32, %v442_v1  ;;  %623 = vst.msk [vmem:[#allocation5 + $0x10] sm:$0xff] %vm363_vm8, %v517_v19 }
 0x25c   :  { %v544_v25 = vadd.f32 %v910_v9, %v523_v18 }
 0x25d   :  { %v561_v24 = vadd.f32 %v557_v29, %v542_v11 }
 0x25e   :  { %v563_v26 = vadd.f32 %v559_v46, %v544_v25 }
 0x25f   :  { %v580_v27 = vadd.f32 %v576_v39, %v561_v24 }
 0x260   :  { %v582_v31 = vadd.f32 %v578_v38, %v563_v26 }
 0x261   :  { %v599_v32 = vadd.f32 %v906_v8, %v580_v27 }
 0x262   :  { %v601_v22 = vadd.f32 %v914_v14, %v582_v31 }
 0x263   :  { %v618_v35 = vadd.f32 %v614_v57, %v599_v32 }
 0x264   :  { %v620_v20 = vadd.f32 %v616_v60, %v601_v22 }
 0x265   :  { %622 = vst.msk [vmem:[#allocation5 + $0x8] sm:$0xff] %vm363_vm8, %v618_v35 }
 0x266   :  { %624 = vst.msk [vmem:[#allocation5 + $0x18] sm:$0xff] %vm363_vm8, %v620_v20 }
 0x267   :  { %740 = shalt.err (!%p737_p12)
}
 0x268   :  { %s741_s24 = scalar_lea.hbm %s1073_s1, 512 }
 0x269   :  { %p742_p13 = scmp.ne.s32.totalorder %s1073_s1, %s741_s24  ;;  %p745_p0 = scmp.lt.u32.totalorder %s741_s24, %s1073_s1 }
 0x26b   :  { %p747_p1 = pnand %p745_p0, %p742_p13 }
 0x26d   :  { %750 = shalt.err (!%p747_p1)
}
 0x26e   :  { %s760_s29 = smov 128   ;;  %s761_s30 = smov 8  }
 0x26f   :  { %636 = dma.vmem_to_hbm [thread:$0]  %s631_s20, 512, %s1073_s1, [#allocation4], %s760_s29, %s760_s29, %s761_s30  }
 0x270   :  { %753 = dma.done.wait [#allocation4], 512  }
 0x271   :  { %754 = vsyncadd [#allocation4], 4294966784 }
 0x272   :  { %640 = vsyncpa [#allocation3], 1 }
 0x273   :  { %641 = vsyncpa [#allocation4], 1 }

</bundles_post_ra>
